<compile_context>
chip_gen: v5e
topology: v5e:2x2
jax: 0.10.0
libtpu: 0.0.40
codegen_flags: <defaults>
</compile_context>

<pallas_src>
import functools

import jax
import jax.numpy as jnp
from jax import lax
from jax.experimental import pallas as pl
from jax.experimental.pallas import tpu as pltpu

_BIG_NEG = -1e30  # finite: exp(-1e30) == 0 and 0 * (-1e30) stays finite


# --------------------------------------------------------------------------
# Kernel
# --------------------------------------------------------------------------
def _kde_kernel(xq_ref, xt_ref, ro_ref, out_ref, acc_ref):
    """One (M-tile, N-tile) grid step.

    xq_ref  : (TM, Dp) VMEM  augmented query features
    xt_ref  : (TN, Dp) VMEM  augmented training features (this N tile)
    ro_ref  : (2,  TN) VMEM  [residuals; ones] for this N tile
    out_ref : (1,  TM) VMEM  lane-dense output (written on last N tile)
    acc_ref : (2,  TM) VMEM  f32 scratch accumulator [num; den]
    """
    k = pl.program_id(1)

    @pl.when(k == 0)
    def _():
        acc_ref[...] = jnp.zeros_like(acc_ref)

    # logits[n, m] = -inv_bw * ||x_m - X_n||^2, entirely on the MXU via the
    # augmented features (contract last dim of both -> no transpose needed).
    logits = lax.dot_general(
        xt_ref[...], xq_ref[...],
        dimension_numbers=(((1,), (1,)), ((), ())),
        preferred_element_type=jnp.float32)              # (TN, TM)

    # Guard fp round-off (true d2 >= 0 => logits <= 0), then kernel weights.
    # exp kept in f32: v5e has no bf16 EUP, and f32 keeps the tight tolerance.
    w = jnp.exp(jnp.minimum(logits, 0.0))                # (TN, TM)

    # Partial [numerator; denominator] sums over this N tile, reduced on MXU.
    # In the bf16 fast path ro is bf16, so w is cast to match (acc stays f32).
    acc_ref[...] += jnp.dot(ro_ref[...], w.astype(ro_ref.dtype),
                            preferred_element_type=jnp.float32)   # (2, TM)

    @pl.when(k == pl.num_programs(1) - 1)
    def _():
        num = acc_ref[0:1, :]
        den = acc_ref[1:2, :]
        out_ref[...] = num / (den + 1e-8)


# --------------------------------------------------------------------------
# Tiling / helpers
# --------------------------------------------------------------------------
def _round_up(a, b):
    return ((a + b - 1) // b) * b


def _cdiv(a, b):
    return -(-a // b)


def _choose_m_tiling(m, tm_cap=512):
    """Pick (tm, m_pad). Guarantees >=2 M tiles when m spans >1 base tile so
    the 'parallel' axis is sharded across both v7x TensorCores."""
    m128 = _round_up(max(m, 1), 128)
    if m128 <= 128:
        km = 1
    else:
        km = max(2, _cdiv(m128, tm_cap))
    tm = _round_up(_cdiv(m128, km), 128)
    return tm, tm * km


def _choose_n_tiling(n, tn_cap=2048):
    """Pick (tn, n_pad): big reduction tiles, padding kept near one base tile."""
    n128 = _round_up(max(n, 1), 128)
    kn = _cdiv(n128, tn_cap)
    tn = _round_up(_cdiv(n128, kn), 128)
    return tn, tn * kn


def _scott_bandwidth(X):
    n, d = X.shape
    # torch.Tensor.std defaults to the unbiased estimator (ddof=1).
    std_devs = jnp.std(X, axis=0, ddof=1)
    return jnp.mean(std_devs) * (float(n) ** (-1.0 / (d + 4)))


# --------------------------------------------------------------------------
# Pallas call wrapper
# --------------------------------------------------------------------------
def _kde_pallas(x_aug, X_aug, res_ones, tm, tn):
    m_pad, d_aug = x_aug.shape
    n_pad = X_aug.shape[0]
    grid = (m_pad // tm, n_pad // tn)

    return pl.pallas_call(
        _kde_kernel,
        out_shape=jax.ShapeDtypeStruct((1, m_pad), jnp.float32),
        grid_spec=pltpu.PrefetchScalarGridSpec(
            num_scalar_prefetch=0,
            grid=grid,
            in_specs=[
                pl.BlockSpec((tm, d_aug), lambda i, k: (i, 0)),   # queries
                pl.BlockSpec((tn, d_aug), lambda i, k: (k, 0)),   # train pts
                pl.BlockSpec((2, tn), lambda i, k: (0, k)),       # [res; ones]
            ],
            out_specs=pl.BlockSpec((1, tm), lambda i, k: (0, i)), # lane-dense
            scratch_shapes=[pltpu.VMEM((2, tm), jnp.float32)],
        ),
        compiler_params=pltpu.CompilerParams(
            dimension_semantics=("parallel", "arbitrary"),
            vmem_limit_bytes=48 * 1024 * 1024,   # safe on v7x (64 MiB phys)
        ),
    )(x_aug, X_aug, res_ones)


# --------------------------------------------------------------------------
# Precompute (module state) + query path
# --------------------------------------------------------------------------
def make_kde_estimator(X, residuals, *, fast=False, tm_cap=512, tn_cap=2048):
    """Builds a jitted estimator. X / residuals / bandwidth are precomputed
    once (they are fixed module state in the PyTorch class)."""
    X = jnp.asarray(X, jnp.float32)
    residuals = jnp.asarray(residuals, jnp.float32)
    n, d = X.shape
    compute_dtype = jnp.bfloat16 if fast else jnp.float32

    d_aug = _round_up(d + 2, 8)
    tn, n_pad = _choose_n_tiling(n, tn_cap)

    bandwidth = _scott_bandwidth(X)
    inv_bw = 1.0 / (2.0 * bandwidth ** 2)

    # ---- augmented training features (single concat + pad, done once) ----
    X_sq = jnp.sum(X * X, axis=1)
    pad_n = n_pad - n
    X_blk = jnp.pad(X, ((0, pad_n), (0, 0)))
    one_col = jnp.pad(jnp.ones((n, 1), jnp.float32), ((0, pad_n), (0, 0)))
    # Padded training rows -> logits = -1e30 -> weight exactly 0 (masked out).
    norm_col = jnp.pad((-inv_bw * X_sq)[:, None], ((0, pad_n), (0, 0)),
                       constant_values=_BIG_NEG)
    X_aug = jnp.concatenate([X_blk, one_col, norm_col], axis=1)
    X_aug = jnp.pad(X_aug, ((0, 0), (0, d_aug - (d + 2)))).astype(compute_dtype)

    res_ones = jnp.stack([residuals, jnp.ones_like(residuals)], axis=0)
    res_ones = jnp.pad(res_ones, ((0, 0), (0, pad_n))).astype(compute_dtype)

    def estimate(x):
        x = x.astype(jnp.float32)
        m = x.shape[0]
        tm, m_pad = _choose_m_tiling(m, tm_cap)

        # ---- augmented query features ----
        x_sq = jnp.sum(x * x, axis=1)
        x_aug = jnp.concatenate(
            [x * (2.0 * inv_bw),
             (-inv_bw * x_sq)[:, None],
             jnp.ones((m, 1), jnp.float32)], axis=1)
        x_aug = jnp.pad(x_aug, ((0, m_pad - m), (0, d_aug - (d + 2))))
        x_aug = x_aug.astype(compute_dtype)

        out = _kde_pallas(x_aug, X_aug, res_ones, tm, tn)
        return out[0, :m]

    return jax.jit(estimate)


def kde_residual_estimate(x, X, residuals, **kwargs):
    """One-shot convenience wrapper (precompute + query in one call)."""
    return make_kde_estimator(X, residuals, **kwargs)(x)


# --------------------------------------------------------------------------
# Pure-JAX reference (mirrors the PyTorch forward, direct differences)
# --------------------------------------------------------------------------
def kde_residual_estimate_ref(x, X, residuals):
    X = X.astype(jnp.float32)
    x = x.astype(jnp.float32)
    bandwidth = _scott_bandwidth(X)
    inv_bw_sq = 1.0 / (2.0 * bandwidth ** 2)
    d2 = jnp.sum((x[:, None, :] - X[None, :, :]) ** 2, axis=-1)
    w = jnp.exp(-d2 * inv_bw_sq)
    return jnp.sum(w * residuals[None, :], axis=1) / (jnp.sum(w, axis=1) + 1e-8)


# --------------------------------------------------------------------------
# Demo / self-check
# --------------------------------------------------------------------------
if __name__ == "__main__":
    key = jax.random.PRNGKey(0)
    k1, k2, k3 = jax.random.split(key, 3)

    n_samples, dim = 300, 4    # training points X: (n_samples, dim)
    m_samples = 200            # query points x:    (m_samples, dim)

    X = jax.random.normal(k1, (n_samples, dim), dtype=jnp.float32)
    residuals = jax.random.normal(k2, (n_samples,), dtype=jnp.float32)
    x = jax.random.normal(k3, (m_samples, dim), dtype=jnp.float32)

    ref = kde_residual_estimate_ref(x, X, residuals)

    # 1) Production tiling (large tiles, 2 parallel M tiles at this size).
    est = make_kde_estimator(X, residuals)
    out = jax.block_until_ready(est(x))
    assert out.shape == (m_samples,)
    assert jnp.allclose(out, ref, atol=1e-4, rtol=1e-3), float(
        jnp.max(jnp.abs(out - ref)))

    # 2) Tiny tiles to exercise the multi-step N reduction and M-axis grid.
    est_small = make_kde_estimator(X, residuals, tm_cap=128, tn_cap=128)
    out_small = jax.block_until_ready(est_small(x))
    assert jnp.allclose(out_small, ref, atol=1e-4, rtol=1e-3), float(
        jnp.max(jnp.abs(out_small - ref)))

    # 3) bf16 fast path: smoke test only (reduced precision by design).
    out_fast = jax.block_until_ready(
        make_kde_estimator(X, residuals, fast=True)(x))
    assert out_fast.shape == (m_samples,)
    assert bool(jnp.all(jnp.isfinite(out_fast)))

    print("KERNEL_OK")
</pallas_src>

<mosaic_0001>
module attributes {stable_mosaic.version = 11 : i64} {
  func.func @_kde_kernel(%arg0: i32, %arg1: i32, %arg2: memref<128x8xf32, #tpu.memory_space<vmem>>, %arg3: memref<384x8xf32, #tpu.memory_space<vmem>>, %arg4: memref<2x384xf32, #tpu.memory_space<vmem>>, %arg5: memref<1x128xf32, #tpu.memory_space<vmem>>, %arg6: memref<2x128xf32, #tpu.memory_space<vmem>>) attributes {dimension_semantics = [#tpu.dimension_semantics<parallel>, #tpu.dimension_semantics<arbitrary>], iteration_bounds = array<i64: 2, 1>, scalar_prefetch = 0 : i64, scratch_operands = 1 : i64, tpu.core_type = #tpu.core_type<tc>, window_params = [{transform_indices = @transform_0, window_bounds = array<i64: 128, 8>}, {transform_indices = @transform_1, window_bounds = array<i64: 384, 8>}, {transform_indices = @transform_2, window_bounds = array<i64: 2, 384>}, {transform_indices = @transform_3, window_bounds = array<i64: 1, 128>}]} {
    %c0_i32 = arith.constant 0 : i32
    %0 = arith.cmpi eq, %arg1, %c0_i32 : i32
    %1 = arith.extui %0 : i1 to i32
    %c0_i32_0 = arith.constant 0 : i32
    %2 = arith.cmpi ne, %1, %c0_i32_0 : i32
    scf.if %2 {
      %cst_14 = arith.constant 0.000000e+00 : f32
      %17 = vector.broadcast %cst_14 : f32 to vector<2x128xf32>
      %c0_15 = arith.constant 0 : index
      %c0_16 = arith.constant 0 : index
      %18 = vector.load %arg6[%c0_15, %c0_16] : memref<2x128xf32, #tpu.memory_space<vmem>>, vector<2x128xf32>
      tpu.vector_store %arg6[%c0_15, %c0_16], %17 {strides = array<i32>} : memref<2x128xf32, #tpu.memory_space<vmem>>, vector<2x128xf32>,
    } else {
    }
    %c0 = arith.constant 0 : index
    %c0_1 = arith.constant 0 : index
    %3 = vector.load %arg3[%c0, %c0_1] : memref<384x8xf32, #tpu.memory_space<vmem>>, vector<384x8xf32>
    %c0_2 = arith.constant 0 : index
    %c0_3 = arith.constant 0 : index
    %4 = vector.load %arg2[%c0_2, %c0_3] : memref<128x8xf32, #tpu.memory_space<vmem>>, vector<128x8xf32>
    %cst = arith.constant dense<0.000000e+00> : vector<384x128xf32>
    %5 = tpu.matmul %3, %4, %cst {dimension_numbers = #tpu.dot_dimension_numbers<[1], [1], [0], [0], [0, 0, 1, 0], [], []>} : vector<384x8xf32>, vector<128x8xf32>, vector<384x128xf32> -> vector<384x128xf32>
    %cst_4 = arith.constant 0.000000e+00 : f32
    %6 = vector.broadcast %cst_4 : f32 to vector<384x128xf32>
    %7 = arith.minimumf %5, %6 : vector<384x128xf32>
    %8 = math.exp %7 : vector<384x128xf32>
    %c0_5 = arith.constant 0 : index
    %c0_6 = arith.constant 0 : index
    %9 = vector.load %arg6[%c0_5, %c0_6] : memref<2x128xf32, #tpu.memory_space<vmem>>, vector<2x128xf32>
    %c0_7 = arith.constant 0 : index
    %c0_8 = arith.constant 0 : index
    %10 = vector.load %arg4[%c0_7, %c0_8] : memref<2x384xf32, #tpu.memory_space<vmem>>, vector<2x384xf32>
    %cst_9 = arith.constant dense<0.000000e+00> : vector<2x128xf32>
    %11 = tpu.matmul %10, %8, %cst_9 {dimension_numbers = #tpu.dot_dimension_numbers<[1], [0], [0], [1], [0, 0, 1, 1], [], []>} : vector<2x384xf32>, vector<384x128xf32>, vector<2x128xf32> -> vector<2x128xf32>
    %12 = arith.addf %9, %11 : vector<2x128xf32>
    %c0_10 = arith.constant 0 : index
    %c0_11 = arith.constant 0 : index
    %13 = vector.load %arg6[%c0_10, %c0_11] : memref<2x128xf32, #tpu.memory_space<vmem>>, vector<2x128xf32>
    tpu.vector_store %arg6[%c0_10, %c0_11], %12 {strides = array<i32>} : memref<2x128xf32, #tpu.memory_space<vmem>>, vector<2x128xf32>,
    %c0_i32_12 = arith.constant 0 : i32
    %14 = arith.cmpi eq, %arg1, %c0_i32_12 : i32
    %15 = arith.extui %14 : i1 to i32
    %c0_i32_13 = arith.constant 0 : i32
    %16 = arith.cmpi ne, %15, %c0_i32_13 : i32
    scf.if %16 {
      %c0_14 = arith.constant 0 : index
      %c0_15 = arith.constant 0 : index
      %17 = vector.load %arg6[%c0_14, %c0_15] : memref<2x128xf32, #tpu.memory_space<vmem>>, vector<1x128xf32>
      %c1 = arith.constant 1 : index
      %c0_16 = arith.constant 0 : index
      %18 = vector.load %arg6[%c1, %c0_16] : memref<2x128xf32, #tpu.memory_space<vmem>>, vector<1x128xf32>
      %cst_17 = arith.constant 9.99999993E-9 : f32
      %19 = vector.broadcast %cst_17 : f32 to vector<1x128xf32>
      %20 = arith.addf %18, %19 : vector<1x128xf32>
      %21 = arith.divf %17, %20 : vector<1x128xf32>
      %c0_18 = arith.constant 0 : index
      %c0_19 = arith.constant 0 : index
      %22 = vector.load %arg5[%c0_18, %c0_19] : memref<1x128xf32, #tpu.memory_space<vmem>>, vector<1x128xf32>
      tpu.vector_store %arg5[%c0_18, %c0_19], %21 {strides = array<i32>} : memref<1x128xf32, #tpu.memory_space<vmem>>, vector<1x128xf32>,
    } else {
    }
    return
  }
  func.func @transform_0(%arg0: i32, %arg1: i32) -> (i32, i32) {
    %c0_i32 = arith.constant 0 : i32
    %c0_i32_0 = arith.constant 0 : i32
    return %arg0, %c0_i32 : i32, i32
  }
  func.func @transform_1(%arg0: i32, %arg1: i32) -> (i32, i32) {
    %c0_i32 = arith.constant 0 : i32
    %c0_i32_0 = arith.constant 0 : i32
    return %arg1, %c0_i32 : i32, i32
  }
  func.func @transform_2(%arg0: i32, %arg1: i32) -> (i32, i32) {
    %c0_i32 = arith.constant 0 : i32
    %c0_i32_0 = arith.constant 0 : i32
    return %c0_i32, %arg1 : i32, i32
  }
  func.func @transform_3(%arg0: i32, %arg1: i32) -> (i32, i32) {
    %c0_i32 = arith.constant 0 : i32
    %c0_i32_0 = arith.constant 0 : i32
    return %c0_i32, %arg0 : i32, i32
  }
}

</mosaic_0001>

<bundles_post_ra>
// kernel: estimate.1
= control target key start
LH: loop header
LB: loop body
LE: loop exit
PB: predicated region body
PF: predicated region fallthrough
CT: control target
= control target key end

     0   :  { %8 = vsyncpa [#allocation4], 0  ;;  %s1840_s0 = inlined_call_operand.vmem [shape: f32[256,8], index: 0, kind: input, shape index: {}]   ;;  %s1841_s1 = inlined_call_operand.vmem [shape: f32[384,8], index: 1, kind: input, shape index: {}]   ;;  %s1842_s2 = inlined_call_operand.vmem [shape: f32[2,384], index: 2, kind: input, shape index: {}]   ;;  %s1843_s3 = inlined_call_operand.hbm [shape: f32[1,256], index: 3, kind: output, shape index: {}]  }
   0x1   :  { %10 = vsyncpa [#allocation4 + $0x1], 0  ;;  %s1371_s12 = smov 0   ;;  %s1373_s13 = smov 0  }
   0x2   :  { %s1375_s14 = smov 0   ;;  %s1377_s15 = smov 0  }
   0x3   :  { %s1379_s16 = smov 0   ;;  %s1381_s17 = smov 0  }
   0x4 LB: > { %s993_s18 = sadd.s32 4294967295, %s1348_s17   ;;  %s994_s19 = sadd.s32 4294967294, %s1348_s17   ;;  %s1348_s17 = sphi %s1381_s17, %s16_s17   ;;  %s1344_s16 = sphi %s1379_s16, %s1850_s16   ;;  %s1340_s15 = sphi %s1377_s15, %s1849_s15   ;;  %s1336_s14 = sphi %s1375_s14, %s1848_s14   ;;  %s1332_s13 = sphi %s1373_s13, %s1847_s13   ;;  %s1328_s12 = sphi %s1371_s12, %s1846_s12  }
   0x5   : > { %s28_s20 = sadd.s32 1, %s1344_s16  ;;  %s113_s21 = sadd.s32 1, %s1336_s14 }
   0x6   : > { %p30_p0 = scmp.ge.s32.totalorder %s28_s20, 2  ;;  %p123_p1 = scmp.ne.s32.totalorder %s1336_s14, %s1332_s13 }
   0x7   : > { %p124_p2 = scmp.eq.s32.totalorder %s993_s18, 1  ;;  %p129_p3 = scmp.ne.s32.totalorder %s1332_s13, %s1328_s12 }
   0x8   : > { %s1852_s20 = smov (%p30_p0, %s28_s20), 0  ;;  %p130_p5 = scmp.eq.s32.totalorder %s994_s19, 1 }
   0x9   : > { %p1411_p4 = por %p124_p2, %p123_p1  ;;  %s110_s23 = ssub.s32 %s1344_s16, %s1852_s20 }
   0xa   : > { %p999_p6 = scmp.ge.s32.totalorder %s1348_s17, 1  ;;  %p111_p7 = scmp.eq.s32.totalorder %s110_s23, 0 }
   0xb   : > { %p1418_p8 = por %p130_p5, %p129_p3  ;;  %p175_p9 = scmp.lt.s32.totalorder %s1348_s17, 3 }
   0xc   : > { %s1424_s25 = scalar_select %p111_p7, %s1336_s14, %s113_s21  }
   0xd   : > { %p176_p10 = pnand %p999_p6, %p175_p9 }
   0xe   : > { %s1000_s26 = sshll.u32 (!%p176_p10), %s1340_s15, 4  ;;  %s1290_s11 = scalar_lea.hbm (!%p176_p10), %s1843_s3, 2 }
   0xf   : > { %179 = sbr.rel (%p176_p10) target bundleno = 518 (0x206), region = 32  ;;  %p209_p11 = scmp.lt.s32.totalorder (!%p176_p10), %s1000_s26, 31 }
  0x14   : > { %s1854_s26 = smov (!%p209_p11, %s1000_s26), 31  ;;  %vm295_vm0 = vcmask 64512   ;;  %v231_v16 = vld [vmem:[%s1841_s1] sm:$0xff]  ;;  %v244_v17 = vld [vmem:[%s1841_s1 + $0x68] sm:$0xff]  ;;  %v245_v21 = vld [vmem:[%s1841_s1 + $0x70] sm:$0xff] }
  0x15   : > { %s1001_s27 = sshll.u32 %s1854_s26, 3  ;;  %v255_v18 = vld [vmem:[%s1841_s1 + $0xc0] sm:$0xff]  ;;  %v232_v20 = vld [vmem:[%s1841_s1 + $0x8] sm:$0xff]  ;;  %v233_v24 = vld [vmem:[%s1841_s1 + $0x10] sm:$0xff] }
  0x16   : > { %s1430_s30 = scalar_lea.vmem %s1840_s0, %s1001_s27  ;;  %v267_v19 = vld [vmem:[%s1841_s1 + $0x120] sm:$0xff]  ;;  %v256_v22 = vld [vmem:[%s1841_s1 + $0xc8] sm:$0xff]  ;;  %v246_v25 = vld [vmem:[%s1841_s1 + $0x78] sm:$0xff]  ;;  %s206_s27 = sand.u32 1, %s1332_s13  }
  0x17   : > { %v294_v0 = vld [vmem:[%s1430_s30 + $0x78] sm:$0xff]  ;;  %v293_v1 = vld [vmem:[%s1430_s30 + $0x70] sm:$0xff]  ;;  %v292_v2 = vld [vmem:[%s1430_s30 + $0x68] sm:$0xff]  ;;  %s207_s4 = scalar_lea.vmem [#allocation3], %s206_s27  ;;  %s888_s7 = scalar_lea.sflag [#allocation4], %s206_s27 }
  0x18   : > { %1002 = vmatpush.xpose.msk.msra.mxu0 %vm295_vm0, %v294_v0  ;;  %1068 = vmatpush.xpose.msk.msra.mxu1 %vm295_vm0, %v294_v0  ;;  %v291_v3 = vld [vmem:[%s1430_s30 + $0x60] sm:$0xff]  ;;  %v290_v4 = vld [vmem:[%s1430_s30 + $0x58] sm:$0xff]  ;;  %v289_v5 = vld [vmem:[%s1430_s30 + $0x50] sm:$0xff]  ;;  %s898_s5 = sshll.u32 %s207_s4, 4  ;;  %s899_s5 = int_to_ptr.vmem [resolvable:$true] %s898_s5 }
  0x19   : > { %1069 = vmatpush.xpose.msk.msra.mxu2 %vm295_vm0, %v294_v0  ;;  %1070 = vmatpush.xpose.msk.msra.mxu3 %vm295_vm0, %v294_v0  ;;  %v288_v6 = vld [vmem:[%s1430_s30 + $0x48] sm:$0xff]  ;;  %v287_v7 = vld [vmem:[%s1430_s30 + $0x40] sm:$0xff]  ;;  %v286_v8 = vld [vmem:[%s1430_s30 + $0x38] sm:$0xff] }
  0x1a   : > { %v285_v9 = vld [vmem:[%s1430_s30 + $0x30] sm:$0xff]  ;;  %v284_v10 = vld [vmem:[%s1430_s30 + $0x28] sm:$0xff]  ;;  %v283_v11 = vld [vmem:[%s1430_s30 + $0x20] sm:$0xff] }
  0x1b   : > { %v282_v12 = vld [vmem:[%s1430_s30 + $0x18] sm:$0xff]  ;;  %v281_v13 = vld [vmem:[%s1430_s30 + $0x10] sm:$0xff]  ;;  %v280_v14 = vld [vmem:[%s1430_s30 + $0x8] sm:$0xff] }
  0x1c   : > { %1003 = vmatpush.xpose.msk.msra.mxu0 %vm295_vm0, %v293_v1  ;;  %1071 = vmatpush.xpose.msk.msra.mxu1 %vm295_vm0, %v293_v1  ;;  %v279_v15 = vld [vmem:[%s1430_s30] sm:$0xff]  ;;  %v268_v23 = vld [vmem:[%s1841_s1 + $0x128] sm:$0xff]  ;;  %v257_v26 = vld [vmem:[%s1841_s1 + $0xd0] sm:$0xff]  ;;  %s896_s30 = scalar_lea.hbm %s1843_s3, %s1340_s15 }
  0x1d   : > { %1072 = vmatpush.xpose.msk.msra.mxu2 %vm295_vm0, %v293_v1  ;;  %1073 = vmatpush.xpose.msk.msra.mxu3 %vm295_vm0, %v293_v1  ;;  %v269_v27 = vld [vmem:[%s1841_s1 + $0x130] sm:$0xff]  ;;  %v234_v28 = vld [vmem:[%s1841_s1 + $0x18] sm:$0xff]  ;;  %v247_v29 = vld [vmem:[%s1841_s1 + $0x80] sm:$0xff]  ;;  %s900_s6 = sshll.u32 %s896_s30, 4  ;;  %s901_s6 = int_to_ptr.hbm [resolvable:$true] %s900_s6 }
  0x1e   : > { %v258_v30 = vld [vmem:[%s1841_s1 + $0xd8] sm:$0xff]  ;;  %v235_v32 = vld [vmem:[%s1841_s1 + $0x20] sm:$0xff]  ;;  %v248_v33 = vld [vmem:[%s1841_s1 + $0x88] sm:$0xff]  ;;  %s1284_s8 = sshra.s32 %s901_s6, 4  ;;  %s1285_s8 = int_to_ptr.hbm [resolvable:$true] %s1284_s8 }
  0x1f   : > { %v270_v31 = vld [vmem:[%s1841_s1 + $0x138] sm:$0xff]  ;;  %v259_v34 = vld [vmem:[%s1841_s1 + $0xe0] sm:$0xff]  ;;  %v236_v36 = vld [vmem:[%s1841_s1 + $0x28] sm:$0xff]  ;;  %s1286_s15 = scalar_lea.hbm %s1285_s8, 1  ;;  %p1291_p1 = scmp.lt.s32.totalorder %s1285_s8, %s1843_s3 }
  0x20   : > { %1004 = vmatpush.xpose.msk.msra.mxu0 %vm295_vm0, %v292_v2  ;;  %1074 = vmatpush.xpose.msk.msra.mxu1 %vm295_vm0, %v292_v2  ;;  %v271_v35 = vld [vmem:[%s1841_s1 + $0x140] sm:$0xff]  ;;  %v249_v37 = vld [vmem:[%s1841_s1 + $0x90] sm:$0xff]  ;;  %v260_v38 = vld [vmem:[%s1841_s1 + $0xe8] sm:$0xff]  ;;  %p1287_p12 = scmp.ne.s32.totalorder %s1285_s8, %s1286_s15  ;;  %p1292_p2 = scmp.lt.s32.totalorder %s1290_s11, %s1286_s15 }
  0x21   : > { %1075 = vmatpush.xpose.msk.msra.mxu2 %vm295_vm0, %v292_v2  ;;  %1076 = vmatpush.xpose.msk.msra.mxu3 %vm295_vm0, %v292_v2  ;;  %v272_v39 = vld [vmem:[%s1841_s1 + $0x148] sm:$0xff]  ;;  %v237_v40 = vld [vmem:[%s1841_s1 + $0x30] sm:$0xff]  ;;  %v250_v41 = vld [vmem:[%s1841_s1 + $0x98] sm:$0xff] }
  0x22   : > { %v261_v42 = vld [vmem:[%s1841_s1 + $0xf0] sm:$0xff]  ;;  %v238_v44 = vld [vmem:[%s1841_s1 + $0x38] sm:$0xff]  ;;  %v251_v45 = vld [vmem:[%s1841_s1 + $0xa0] sm:$0xff]  ;;  %p1288_p13 = pnand %p1287_p12, %p1411_p4  ;;  %p1293_p3 = por %p1292_p2, %p1291_p1 }
  0x23   : > { %v273_v43 = vld [vmem:[%s1841_s1 + $0x150] sm:$0xff]  ;;  %v262_v46 = vld [vmem:[%s1841_s1 + $0xf8] sm:$0xff]  ;;  %v239_v48 = vld [vmem:[%s1841_s1 + $0x40] sm:$0xff] }
  0x24   : > { %1005 = vmatpush.xpose.msk.msra.mxu0 %vm295_vm0, %v291_v3  ;;  %1077 = vmatpush.xpose.msk.msra.mxu1 %vm295_vm0, %v291_v3  ;;  %v274_v47 = vld [vmem:[%s1841_s1 + $0x158] sm:$0xff]  ;;  %v252_v49 = vld [vmem:[%s1841_s1 + $0xa8] sm:$0xff]  ;;  %v275_v50 = vld [vmem:[%s1841_s1 + $0x160] sm:$0xff]  ;;  %p1289_p0 = pneg %p1288_p13 }
  0x25   : > { %1078 = vmatpush.xpose.msk.msra.mxu2 %vm295_vm0, %v291_v3  ;;  %1079 = vmatpush.xpose.msk.msra.mxu3 %vm295_vm0, %v291_v3  ;;  %v263_v51 = vld [vmem:[%s1841_s1 + $0x100] sm:$0xff]  ;;  %v240_v52 = vld [vmem:[%s1841_s1 + $0x48] sm:$0xff]  ;;  %v253_v53 = vld [vmem:[%s1841_s1 + $0xb0] sm:$0xff] }
  0x26   : > { %v276_v54 = vld [vmem:[%s1841_s1 + $0x168] sm:$0xff]  ;;  %v241_v56 = vld [vmem:[%s1841_s1 + $0x50] sm:$0xff]  ;;  %v254_v57 = vld [vmem:[%s1841_s1 + $0xb8] sm:$0xff]  ;;  %p1294_p5 = pnand %p1293_p3, %p1289_p0 }
  0x27   : > { %v264_v55 = vld [vmem:[%s1841_s1 + $0x108] sm:$0xff]  ;;  %v277_v58 = vld [vmem:[%s1841_s1 + $0x170] sm:$0xff]  ;;  %v242_v60 = vld [vmem:[%s1841_s1 + $0x58] sm:$0xff] }
  0x28   : > { %1006 = vmatpush.xpose.msk.msra.mxu0 %vm295_vm0, %v290_v4  ;;  %1080 = vmatpush.xpose.msk.msra.mxu1 %vm295_vm0, %v290_v4  ;;  %v265_v59 = vld [vmem:[%s1841_s1 + $0x110] sm:$0xff]  ;;  %v278_v61 = vld [vmem:[%s1841_s1 + $0x178] sm:$0xff]  ;;  %v243_v63 = vld [vmem:[%s1841_s1 + $0x60] sm:$0xff] }
  0x29   : > { %1081 = vmatpush.xpose.msk.msra.mxu2 %vm295_vm0, %v290_v4  ;;  %1082 = vmatpush.xpose.msk.msra.mxu3 %vm295_vm0, %v290_v4  ;;  %v266_v62 = vld [vmem:[%s1841_s1 + $0x118] sm:$0xff] }
  0x2c   : > { %1007 = vmatpush.xpose.msk.msra.mxu0 %vm295_vm0, %v289_v5  ;;  %1083 = vmatpush.xpose.msk.msra.mxu1 %vm295_vm0, %v289_v5 }
  0x2d   : > { %1084 = vmatpush.xpose.msk.msra.mxu2 %vm295_vm0, %v289_v5  ;;  %1085 = vmatpush.xpose.msk.msra.mxu3 %vm295_vm0, %v289_v5 }
  0x30   : > { %1008 = vmatpush.xpose.msk.msra.mxu0 %vm295_vm0, %v288_v6  ;;  %1086 = vmatpush.xpose.msk.msra.mxu1 %vm295_vm0, %v288_v6 }
  0x31   : > { %1087 = vmatpush.xpose.msk.msra.mxu2 %vm295_vm0, %v288_v6  ;;  %1088 = vmatpush.xpose.msk.msra.mxu3 %vm295_vm0, %v288_v6 }
  0x34   : > { %1009 = vmatpush.xpose.msk.msra.mxu0 %vm295_vm0, %v287_v7  ;;  %1089 = vmatpush.xpose.msk.msra.mxu1 %vm295_vm0, %v287_v7 }
  0x35   : > { %1090 = vmatpush.xpose.msk.msra.mxu2 %vm295_vm0, %v287_v7  ;;  %1091 = vmatpush.xpose.msk.msra.mxu3 %vm295_vm0, %v287_v7 }
  0x38   : > { %1010 = vmatpush.xpose.msk.msra.mxu0 %vm295_vm0, %v286_v8  ;;  %1092 = vmatpush.xpose.msk.msra.mxu1 %vm295_vm0, %v286_v8 }
  0x39   : > { %1093 = vmatpush.xpose.msk.msra.mxu2 %vm295_vm0, %v286_v8  ;;  %1094 = vmatpush.xpose.msk.msra.mxu3 %vm295_vm0, %v286_v8 }
  0x3c   : > { %1011 = vmatpush.xpose.msk.msra.mxu0 %vm295_vm0, %v285_v9  ;;  %1095 = vmatpush.xpose.msk.msra.mxu1 %vm295_vm0, %v285_v9 }
  0x3d   : > { %1096 = vmatpush.xpose.msk.msra.mxu2 %vm295_vm0, %v285_v9  ;;  %1097 = vmatpush.xpose.msk.msra.mxu3 %vm295_vm0, %v285_v9 }
  0x40   : > { %1012 = vmatpush.xpose.msk.msra.mxu0 %vm295_vm0, %v284_v10  ;;  %1098 = vmatpush.xpose.msk.msra.mxu1 %vm295_vm0, %v284_v10 }
  0x41   : > { %1099 = vmatpush.xpose.msk.msra.mxu2 %vm295_vm0, %v284_v10  ;;  %1100 = vmatpush.xpose.msk.msra.mxu3 %vm295_vm0, %v284_v10 }
  0x44   : > { %1013 = vmatpush.xpose.msk.msra.mxu0 %vm295_vm0, %v283_v11  ;;  %1101 = vmatpush.xpose.msk.msra.mxu1 %vm295_vm0, %v283_v11 }
  0x45   : > { %1102 = vmatpush.xpose.msk.msra.mxu2 %vm295_vm0, %v283_v11  ;;  %1103 = vmatpush.xpose.msk.msra.mxu3 %vm295_vm0, %v283_v11 }
  0x48   : > { %1014 = vmatpush.xpose.msk.msra.mxu0 %vm295_vm0, %v282_v12  ;;  %1104 = vmatpush.xpose.msk.msra.mxu1 %vm295_vm0, %v282_v12 }
  0x49   : > { %1105 = vmatpush.xpose.msk.msra.mxu2 %vm295_vm0, %v282_v12  ;;  %1106 = vmatpush.xpose.msk.msra.mxu3 %vm295_vm0, %v282_v12 }
  0x4c   : > { %1015 = vmatpush.xpose.msk.msra.mxu0 %vm295_vm0, %v281_v13  ;;  %1107 = vmatpush.xpose.msk.msra.mxu1 %vm295_vm0, %v281_v13 }
  0x4d   : > { %1108 = vmatpush.xpose.msk.msra.mxu2 %vm295_vm0, %v281_v13  ;;  %1109 = vmatpush.xpose.msk.msra.mxu3 %vm295_vm0, %v281_v13 }
  0x50   : > { %1016 = vmatpush.xpose.msk.msra.mxu0 %vm295_vm0, %v280_v14  ;;  %1110 = vmatpush.xpose.msk.msra.mxu1 %vm295_vm0, %v280_v14 }
  0x51   : > { %1111 = vmatpush.xpose.msk.msra.mxu2 %vm295_vm0, %v280_v14  ;;  %1112 = vmatpush.xpose.msk.msra.mxu3 %vm295_vm0, %v280_v14 }
  0x54   : > { %1017 = vmatpush.xpose.msk.msra.mxu0 %vm295_vm0, %v279_v15  ;;  %1113 = vmatpush.xpose.msk.msra.mxu1 %vm295_vm0, %v279_v15 }
  0x55   : > { %1114 = vmatpush.xpose.msk.msra.mxu2 %vm295_vm0, %v279_v15  ;;  %1115 = vmatpush.xpose.msk.msra.mxu3 %vm295_vm0, %v279_v15 }
  0x57   : > { %1018 = vmatmul.msk.f32.vlgmr.msra.gmra.mxu0 %vm295_vm0, %v231_v16  ;;  %1031 = vmatmul.msk.f32.vlgmr.msra.gmra.mxu1 %vm295_vm0, %v244_v17 }
  0x58   : > { %1042 = vmatmul.msk.f32.vlgmr.msra.gmra.mxu2 %vm295_vm0, %v255_v18  ;;  %1054 = vmatmul.msk.f32.vlgmr.msra.gmra.mxu3 %vm295_vm0, %v267_v19 }
  0x5f   : > { %1019 = vmatmul.msk.f32.gmra.mxu0 %vm295_vm0, %v232_v20  ;;  %1032 = vmatmul.msk.f32.gmra.mxu1 %vm295_vm0, %v245_v21 }
  0x60   : > { %1043 = vmatmul.msk.f32.gmra.mxu2 %vm295_vm0, %v256_v22  ;;  %1055 = vmatmul.msk.f32.gmra.mxu3 %vm295_vm0, %v268_v23 }
  0x67   : > { %1020 = vmatmul.msk.f32.gmra.mxu0 %vm295_vm0, %v233_v24  ;;  %1033 = vmatmul.msk.f32.gmra.mxu1 %vm295_vm0, %v246_v25 }
  0x68   : > { %1044 = vmatmul.msk.f32.gmra.mxu2 %vm295_vm0, %v257_v26  ;;  %1056 = vmatmul.msk.f32.gmra.mxu3 %vm295_vm0, %v269_v27 }
  0x6f   : > { %1021 = vmatmul.msk.f32.gmra.mxu0 %vm295_vm0, %v234_v28  ;;  %1034 = vmatmul.msk.f32.gmra.mxu1 %vm295_vm0, %v247_v29 }
  0x70   : > { %1045 = vmatmul.msk.f32.gmra.mxu2 %vm295_vm0, %v258_v30  ;;  %1057 = vmatmul.msk.f32.gmra.mxu3 %vm295_vm0, %v270_v31 }
  0x77   : > { %1022 = vmatmul.msk.f32.gmra.mxu0 %vm295_vm0, %v235_v32  ;;  %1035 = vmatmul.msk.f32.gmra.mxu1 %vm295_vm0, %v248_v33 }
  0x78   : > { %1046 = vmatmul.msk.f32.gmra.mxu2 %vm295_vm0, %v259_v34  ;;  %1058 = vmatmul.msk.f32.gmra.mxu3 %vm295_vm0, %v271_v35 }
  0x7f   : > { %1023 = vmatmul.msk.f32.gmra.mxu0 %vm295_vm0, %v236_v36  ;;  %1036 = vmatmul.msk.f32.gmra.mxu1 %vm295_vm0, %v249_v37 }
  0x80   : > { %1047 = vmatmul.msk.f32.gmra.mxu2 %vm295_vm0, %v260_v38  ;;  %1059 = vmatmul.msk.f32.gmra.mxu3 %vm295_vm0, %v272_v39 }
  0x87   : > { %1024 = vmatmul.msk.f32.gmra.mxu0 %vm295_vm0, %v237_v40  ;;  %1037 = vmatmul.msk.f32.gmra.mxu1 %vm295_vm0, %v250_v41 }
  0x88   : > { %1048 = vmatmul.msk.f32.gmra.mxu2 %vm295_vm0, %v261_v42  ;;  %1060 = vmatmul.msk.f32.gmra.mxu3 %vm295_vm0, %v273_v43 }
  0x8f   : > { %1025 = vmatmul.msk.f32.gmra.mxu0 %vm295_vm0, %v238_v44  ;;  %1038 = vmatmul.msk.f32.gmra.mxu1 %vm295_vm0, %v251_v45 }
  0x90   : > { %1049 = vmatmul.msk.f32.gmra.mxu2 %vm295_vm0, %v262_v46  ;;  %1061 = vmatmul.msk.f32.gmra.mxu3 %vm295_vm0, %v274_v47 }
  0x97   : > { %1026 = vmatmul.msk.f32.gmra.mxu0 %vm295_vm0, %v239_v48  ;;  %1039 = vmatmul.msk.f32.gmra.mxu1 %vm295_vm0, %v252_v49 }
  0x98   : > { %1062 = vmatmul.msk.f32.gmra.mxu3 %vm295_vm0, %v275_v50  ;;  %1050 = vmatmul.msk.f32.gmra.mxu2 %vm295_vm0, %v263_v51 }
  0x9f   : > { %1027 = vmatmul.msk.f32.gmra.mxu0 %vm295_vm0, %v240_v52  ;;  %1040 = vmatmul.msk.f32.gmra.mxu1 %vm295_vm0, %v253_v53 }
  0xa0   : > { %1063 = vmatmul.msk.f32.gmra.mxu3 %vm295_vm0, %v276_v54  ;;  %1051 = vmatmul.msk.f32.gmra.mxu2 %vm295_vm0, %v264_v55 }
  0xa7   : > { %1028 = vmatmul.msk.f32.gmra.mxu0 %vm295_vm0, %v241_v56  ;;  %1041 = vmatmul.msk.f32.gmra.mxu1 %vm295_vm0, %v254_v57 }
  0xa8   : > { %1064 = vmatmul.msk.f32.gmra.mxu3 %vm295_vm0, %v277_v58  ;;  %1052 = vmatmul.msk.f32.gmra.mxu2 %vm295_vm0, %v265_v59 }
  0xaf   : > { %1029 = vmatmul.msk.f32.gmra.mxu0 %vm295_vm0, %v242_v60 }
  0xb0   : > { %1065 = vmatmul.msk.f32.gmra.mxu3 %vm295_vm0, %v278_v61  ;;  %1053 = vmatmul.msk.f32.gmra.mxu2 %vm295_vm0, %v266_v62 }
  0xb7   : > { %1030 = vmatmul.msk.f32.gmra.mxu0 %vm295_vm0, %v243_v63 }
  0xd4   : > { %v1704_v0 = vpop.f32.mrf.mxu0  ;;  %v544_v1 = vpop.f32.mrf.mxu1 }
  0xd5   : > { %v662_v11 = vmin.f32 %v544_v1, 0.0 }
  0xd7   : > { %v723_v15 = vmul.f32 1.442695, %v662_v11 }
  0xdb   : > { %v1706_v2 = vpop.f32.mrf.mxu2  ;;  %v1708_v3 = vpop.f32.mrf.mxu3 }
  0xdc   : > { %v1710_v4 = vpop.f32.mrf.mxu0  ;;  %v547_v5 = vpop.f32.mrf.mxu1  ;;  %v673_v60 = vmin.f32 %v1706_v2, 0.0 }
  0xdd   : > { %v663_v6 = vmin.f32 %v547_v5, 0.0 }
  0xde   : > { %v745_v5 = vmul.f32 1.442695, %v673_v60 }
  0xdf   : > { %v725_v13 = vmul.f32 1.442695, %v663_v6 }
  0xe1   : > { %1172 = vpow2.f32 %v725_v13 }
  0xe3   : > { %v1712_v7 = vpop.f32.mrf.mxu2  ;;  %v1714_v8 = vpop.f32.mrf.mxu3 }
  0xe4   : > { %v1716_v9 = vpop.f32.mrf.mxu0  ;;  %v550_v10 = vpop.f32.mrf.mxu1  ;;  %v674_v54 = vmin.f32 %v1712_v7, 0.0 }
  0xe5   : > { %v664_v12 = vmin.f32 %v550_v10, 0.0 }
  0xe6   : > { %v747_v63 = vmul.f32 1.442695, %v674_v54 }
  0xe7   : > { %v727_v14 = vmul.f32 1.442695, %v664_v12  ;;  %v1173_v20 = vpop.eup %1172 }
  0xe9   : > { %1174 = vpow2.f32 %v727_v14 }
  0xea   : > { %1176 = vpow2.f32 %v723_v15 }
  0xeb   : > { %v583_v16 = vpop.f32.mrf.mxu2  ;;  %v1718_v17 = vpop.f32.mrf.mxu3 }
  0xec   : > { %v1720_v18 = vpop.f32.mrf.mxu0  ;;  %v1722_v19 = vpop.f32.mrf.mxu1  ;;  %v675_v51 = vmin.f32 %v583_v16, 0.0 }
  0xee   : > { %v749_v61 = vmul.f32 1.442695, %v675_v51 }
  0xef   : > { %v1175_v21 = vpop.eup %1174 }
  0xf0   : > { %803 = vmatpush.msrb.mxu1 %v1175_v21  ;;  %v1177_v22 = vpop.eup %1176 }
  0xf2   : > { %804 = vmatpush.msrb.mxu1 %v1173_v20 }
  0xf3   : > { %v586_v23 = vpop.f32.mrf.mxu2  ;;  %v1724_v24 = vpop.f32.mrf.mxu3 }
  0xf4   : > { %v1726_v25 = vpop.f32.mrf.mxu0  ;;  %v1728_v26 = vpop.f32.mrf.mxu1  ;;  %805 = vmatpush.msrb.mxu1 %v1177_v22  ;;  %v676_v50 = vmin.f32 %v586_v23, 0.0 }
  0xf6   : > { %v751_v55 = vmul.f32 1.442695, %v676_v50 }
  0xfb   : > { %v589_v27 = vpop.f32.mrf.mxu2  ;;  %v1730_v28 = vpop.f32.mrf.mxu3 }
  0xfc   : > { %v1732_v29 = vpop.f32.mrf.mxu0  ;;  %v1734_v30 = vpop.f32.mrf.mxu1  ;;  %v677_v47 = vmin.f32 %v589_v27, 0.0 }
  0xfe   : > { %v753_v52 = vmul.f32 1.442695, %v677_v47  ;;  %v665_v47 = vmin.f32 %v1722_v19, 0.0 }
 0x100   : > { %v729_v54 = vmul.f32 1.442695, %v665_v47  ;;  %v653_v47 = vmin.f32 %v1726_v25, 0.0 }
 0x103   : > { %v592_v31 = vpop.f32.mrf.mxu2  ;;  %v1736_v32 = vpop.f32.mrf.mxu3 }
 0x104   : > { %v1738_v33 = vpop.f32.mrf.mxu0  ;;  %v1740_v34 = vpop.f32.mrf.mxu1  ;;  %v678_v40 = vmin.f32 %v592_v31, 0.0 }
 0x105   : > { %v668_v27 = vmin.f32 %v1740_v34, 0.0 }
 0x106   : > { %v755_v48 = vmul.f32 1.442695, %v678_v40 }
 0x10b   : > { %v595_v35 = vpop.f32.mrf.mxu2  ;;  %v1742_v36 = vpop.f32.mrf.mxu3 }
 0x10c   : > { %v1744_v37 = vpop.f32.mrf.mxu0  ;;  %v1746_v38 = vpop.f32.mrf.mxu1  ;;  %v679_v39 = vmin.f32 %v595_v35, 0.0 }
 0x10d   : > { %v669_v21 = vmin.f32 %v1746_v38, 0.0  ;;  %v666_v38 = vmin.f32 %v1728_v26, 0.0 }
 0x10e   : > { %v757_v41 = vmul.f32 1.442695, %v679_v39  ;;  %v667_v39 = vmin.f32 %v1734_v30, 0.0 }
 0x10f   : > { %v737_v40 = vmul.f32 1.442695, %v669_v21  ;;  %v731_v51 = vmul.f32 1.442695, %v666_v38  ;;  %v656_v21 = vmin.f32 %v1744_v37, 0.0 }
 0x110   : > { %1178 = vpow2.f32 %v757_v41 }
 0x111   : > { %v711_v38 = vmul.f32 1.442695, %v656_v21 }
 0x113   : > { %v598_v42 = vpop.f32.mrf.mxu2  ;;  %v1748_v43 = vpop.f32.mrf.mxu3 }
 0x114   : > { %v680_v44 = vmin.f32 %v598_v42, 0.0  ;;  %v1750_v45 = vpop.f32.mrf.mxu0  ;;  %v568_v46 = vpop.f32.mrf.mxu1  ;;  %v685_v42 = vmin.f32 %v1708_v3, 0.0 }
 0x115   : > { %v670_v10 = vmin.f32 %v568_v46, 0.0 }
 0x116   : > { %v759_v49 = vmul.f32 1.442695, %v680_v44  ;;  %v1179_v58 = vpop.eup %1178  ;;  %v735_v44 = vmul.f32 1.442695, %v668_v27  ;;  %v769_v50 = vmul.f32 1.442695, %v685_v42 }
 0x117   : > { %v739_v22 = vmul.f32 1.442695, %v670_v10  ;;  %v654_v42 = vmin.f32 %v1732_v29, 0.0  ;;  %v687_v29 = vmin.f32 %v1718_v17, 0.0  ;;  %v705_v17 = vmul.f32 1.442695, %v653_v47 }
 0x118   : > { %1180 = vpow2.f32 %v759_v49  ;;  %v733_v49 = vmul.f32 1.442695, %v667_v39 }
 0x119   : > { %1182 = vpow2.f32 %v755_v48 }
 0x11a   : > { %1184 = vpow2.f32 %v753_v52 }
 0x11b   : > { %v1752_v53 = vpop.f32.mrf.mxu3  ;;  %1186 = vpow2.f32 %v751_v55  ;;  %v1762_v14 = vpop.f32.mrf.mxu2 }
 0x11c   : > { %v1755_v56 = vpop.f32.mrf.mxu0  ;;  %v571_v57 = vpop.f32.mrf.mxu1  ;;  %1188 = vpow2.f32 %v749_v61 }
 0x11d   : > { %v671_v1 = vmin.f32 %v571_v57, 0.0  ;;  %1190 = vpow2.f32 %v747_v63 }
 0x11e   : > { %v1181_v59 = vpop.eup %1180  ;;  %1192 = vpow2.f32 %v745_v5  ;;  %v658_v5 = vmin.f32 %v1755_v56, 0.0 }
 0x11f   : > { %823 = vmatpush.msrb.mxu2 %v1181_v59  ;;  %v1183_v62 = vpop.eup %1182  ;;  %v741_v2 = vmul.f32 1.442695, %v671_v1 }
 0x120   : > { %v1185_v7 = vpop.eup %1184 }
 0x121   : > { %824 = vmatpush.msrb.mxu2 %v1179_v58  ;;  %v1187_v15 = vpop.eup %1186  ;;  %1194 = vpow2.f32 %v741_v2  ;;  %v794_v58 = vld [vmem:[%s1842_s2] sm:$0x3f] }
 0x122   : > { %v1189_v20 = vpop.eup %1188  ;;  %796 = vst [vmem:[#allocation1] ss:$4 sm:$0xff] %v794_v58  ;;  %v650_v58 = vmin.f32 %v1710_v4, 0.0 }
 0x123   : > { %v1758_v6 = vpop.f32.mrf.mxu3  ;;  %825 = vmatpush.msrb.mxu2 %v1183_v62  ;;  %v1191_v23 = vpop.eup %1190  ;;  %v693_v62 = vmin.f32 %v1752_v53, 0.0 }
 0x124   : > { %v1760_v11 = vpop.f32.mrf.mxu0  ;;  %v574_v12 = vpop.f32.mrf.mxu1  ;;  %v694_v26 = vmin.f32 %v1758_v6, 0.0 }
 0x125   : > { %v672_v13 = vmin.f32 %v574_v12, 0.0  ;;  %826 = vmatpush.msrb.mxu2 %v1185_v7  ;;  %v1193_v35 = vpop.eup %1192  ;;  %v1770_v48 = vpop.f32.mrf.mxu2  ;;  %v659_v59 = vmin.f32 %v1760_v11, 0.0  ;;  %v692_v12 = vmin.f32 %v1748_v43, 0.0  ;;  %v657_v11 = vmin.f32 %v1750_v45, 0.0 }
 0x126   : > { %v787_v2 = vmul.f32 1.442695, %v694_v26  ;;  %v690_v45 = vmin.f32 %v1736_v32, 0.0 }
 0x127   : > { %v743_v16 = vmul.f32 1.442695, %v672_v13  ;;  %827 = vmatpush.msrb.mxu2 %v1187_v15  ;;  %v1195_v46 = vpop.eup %1194  ;;  %v717_v13 = vmul.f32 1.442695, %v659_v59 }
 0x129   : > { %828 = vmatpush.msrb.mxu2 %v1189_v20  ;;  %1196 = vpow2.f32 %v743_v16  ;;  %v691_v16 = vmin.f32 %v1742_v36, 0.0  ;;  %v785_v20 = vmul.f32 1.442695, %v693_v62  ;;  %v798_v36 = vld.sshfl [vmem:[#allocation1 + $0x8] sm:$0xff pattern:$0x73625140] }
 0x12a   : > { %1198 = vpow2.f32 %v739_v22  ;;  %v715_v22 = vmul.f32 1.442695, %v658_v5 }
 0x12b   : > { %v643_v31 = vpop.f32.mrf.mxu3  ;;  %829 = vmatpush.msrb.mxu2 %v1191_v23  ;;  %1200 = vpow2.f32 %v737_v40  ;;  %v783_v23 = vmul.f32 1.442695, %v692_v12  ;;  %v689_v40 = vmin.f32 %v1730_v28, 0.0 }
 0x12c   : > { %v538_v41 = vpop.f32.mrf.mxu0  ;;  %1202 = vpow2.f32 %v735_v44  ;;  %v695_v52 = vmin.f32 %v643_v31, 0.0  ;;  %v655_v31 = vmin.f32 %v1738_v33, 0.0  ;;  %v688_v44 = vmin.f32 %v1724_v24, 0.0 }
 0x12d   : > { %830 = vmatpush.msrb.mxu2 %v1193_v35  ;;  %v660_v3 = vmin.f32 %v538_v41, 0.0  ;;  %1204 = vpow2.f32 %v733_v49  ;;  %v1781_v15 = vpop.f32.mrf.mxu2  ;;  %v713_v35 = vmul.f32 1.442695, %v657_v11  ;;  %v781_v41 = vmul.f32 1.442695, %v691_v16 }
 0x12e   : > { %1206 = vpow2.f32 %v769_v50  ;;  %v789_v63 = vmul.f32 1.442695, %v695_v52  ;;  %v779_v33 = vmul.f32 1.442695, %v690_v45  ;;  %v709_v28 = vmul.f32 1.442695, %v655_v31 }
 0x12f   : > { %v1197_v34 = vpop.eup %1196  ;;  %1208 = vpow2.f32 %v731_v51  ;;  %v719_v6 = vmul.f32 1.442695, %v660_v3  ;;  %v777_v49 = vmul.f32 1.442695, %v689_v40  ;;  %v707_v24 = vmul.f32 1.442695, %v654_v42 }
 0x130   : > { %831 = vmatpush.msrb.mxu2 %v1197_v34  ;;  %v1199_v30 = vpop.eup %1198  ;;  %1210 = vpow2.f32 %v729_v54  ;;  %v686_v54 = vmin.f32 %v1714_v8, 0.0  ;;  %v775_v25 = vmul.f32 1.442695, %v688_v44  ;;  %v681_v11 = vmin.f32 %v1762_v14, 0.0 }
 0x131   : > { %v1201_v61 = vpop.eup %1200  ;;  %v797_v45 = vld.sshfl [vmem:[#allocation1] sm:$0xff pattern:$0x73625140] }
 0x132   : > { %832 = vmatpush.msrb.mxu2 %v1195_v46  ;;  %v1203_v10 = vpop.eup %1202  ;;  %v761_v21 = vmul.f32 1.442695, %v681_v11 }
 0x133   : > { %v646_v55 = vpop.f32.mrf.mxu3  ;;  %v1205_v53 = vpop.eup %1204 }
 0x134   : > { %v696_v57 = vmin.f32 %v646_v55, 0.0  ;;  %v541_v19 = vpop.f32.mrf.mxu0  ;;  %833 = vmatpush.msrb.mxu2 %v1199_v30  ;;  %v1784_v56 = vpop.eup %1206  ;;  %v652_v30 = vmin.f32 %v1720_v18, 0.0  ;;  %v651_v55 = vmin.f32 %v1716_v9, 0.0  ;;  %v649_v9 = vmin.f32 %v1704_v0, 0.0 }
 0x135   : > { %v661_v60 = vmin.f32 %v541_v19, 0.0  ;;  %v1209_v43 = vpop.eup %1208  ;;  %v610_v51 = vpop.f32.mrf.mxu2 }
 0x136   : > { %v791_v1 = vmul.f32 1.442695, %v696_v57  ;;  %834 = vmatpush.msrb.mxu2 %v1201_v61  ;;  %v1211_v27 = vpop.eup %1210  ;;  %v773_v57 = vmul.f32 1.442695, %v687_v29  ;;  %v684_v18 = vmin.f32 %v610_v51, 0.0 }
 0x137   : > { %v721_v7 = vmul.f32 1.442695, %v661_v60  ;;  %v703_v59 = vmul.f32 1.442695, %v652_v30  ;;  %v771_v60 = vmul.f32 1.442695, %v686_v54 }
 0x138   : > { %1212 = vpow2.f32 %v791_v1  ;;  %835 = vmatpush.msrb.mxu2 %v1203_v10  ;;  %v701_v62 = vmul.f32 1.442695, %v651_v55  ;;  %v683_v1 = vmin.f32 %v1781_v15, 0.0  ;;  %v767_v5 = vmul.f32 1.442695, %v684_v18 }
 0x139   : > { %1214 = vpow2.f32 %v721_v7  ;;  %v682_v10 = vmin.f32 %v1770_v48, 0.0  ;;  %v697_v0 = vmul.f32 1.442695, %v649_v9 }
 0x13a   : > { %1216 = vpow2.f32 %v789_v63  ;;  %836 = vmatpush.msrb.mxu2 %v1205_v53 }
 0x13b   : > { %1218 = vpow2.f32 %v719_v6  ;;  %v699_v6 = vmul.f32 1.442695, %v650_v58  ;;  %v763_v16 = vmul.f32 1.442695, %v682_v10 }
 0x13c   : > { %1220 = vpow2.f32 %v787_v2  ;;  %837 = vmatpush.msrb.mxu2 %v1209_v43 }
 0x13d   : > { %1222 = vpow2.f32 %v717_v13  ;;  %v765_v13 = vmul.f32 1.442695, %v683_v1 }
 0x13e   : > { %v1213_v39 = vpop.eup %1212  ;;  %1224 = vpow2.f32 %v785_v20  ;;  %838 = vmatpush.msrb.mxu2 %v1211_v27 }
 0x13f   : > { %v1215_v37 = vpop.eup %1214  ;;  %1226 = vpow2.f32 %v715_v22  ;;  %843 = vmatpush.msrb.mxu3 %v1213_v39  ;;  %839 = vmatmul.f32.vlgmr.msrb.gmra.mxu2 %v798_v36  ;;  %v1350_v39 = vmov 0.0  }
 0x140   : > { %v1217_v32 = vpop.eup %1216  ;;  %1228 = vpow2.f32 %v783_v23  ;;  %806 = vmatpush.msrb.mxu1 %v1215_v37  ;;  %230 = vst [vmem:[#allocation2] sm:$0x3] %v1350_v39 }
 0x141   : > { %v1219_v46 = vpop.eup %1218  ;;  %1230 = vpow2.f32 %v713_v35  ;;  %844 = vmatpush.msrb.mxu3 %v1217_v32  ;;  %v799_v35 = vld.sshfl [vmem:[#allocation1 + $0x10] sm:$0xff pattern:$0x73625140] }
 0x142   : > { %v1221_v34 = vpop.eup %1220  ;;  %1232 = vpow2.f32 %v781_v41  ;;  %807 = vmatpush.msrb.mxu1 %v1219_v46 }
 0x143   : > { %v1223_v50 = vpop.eup %1222  ;;  %1234 = vpow2.f32 %v711_v38  ;;  %845 = vmatpush.msrb.mxu3 %v1221_v34 }
 0x144   : > { %v1225_v52 = vpop.eup %1224  ;;  %1236 = vpow2.f32 %v779_v33  ;;  %808 = vmatpush.msrb.mxu1 %v1223_v50 }
 0x145   : > { %v1227_v3 = vpop.eup %1226  ;;  %1238 = vpow2.f32 %v709_v28  ;;  %846 = vmatpush.msrb.mxu3 %v1225_v52 }
 0x146   : > { %v1229_v26 = vpop.eup %1228  ;;  %1240 = vpow2.f32 %v777_v49  ;;  %809 = vmatpush.msrb.mxu1 %v1227_v3 }
 0x147   : > { %v1231_v19 = vpop.eup %1230  ;;  %1242 = vpow2.f32 %v707_v24  ;;  %847 = vmatpush.msrb.mxu3 %v1229_v26  ;;  %v793_v37 = vld [vmem:[#allocation2] sm:$0x3] }
 0x148   : > { %v1233_v8 = vpop.eup %1232  ;;  %1244 = vpow2.f32 %v775_v25  ;;  %810 = vmatpush.msrb.mxu1 %v1231_v19 }
 0x149   : > { %v1235_v61 = vpop.eup %1234  ;;  %1246 = vpow2.f32 %v705_v17  ;;  %848 = vmatpush.msrb.mxu3 %v1233_v8 }
 0x14a   : > { %v1237_v63 = vpop.eup %1236  ;;  %1248 = vpow2.f32 %v773_v57  ;;  %811 = vmatpush.msrb.mxu1 %v1235_v61 }
 0x14b   : > { %v1239_v4 = vpop.eup %1238  ;;  %1250 = vpow2.f32 %v703_v59  ;;  %849 = vmatpush.msrb.mxu3 %v1237_v63 }
 0x14c   : > { %v1241_v7 = vpop.eup %1240  ;;  %1252 = vpow2.f32 %v771_v60  ;;  %812 = vmatpush.msrb.mxu1 %v1239_v4 }
 0x14d   : > { %v1243_v12 = vpop.eup %1242  ;;  %1254 = vpow2.f32 %v701_v62  ;;  %850 = vmatpush.msrb.mxu3 %v1241_v7 }
 0x14e   : > { %v1245_v2 = vpop.eup %1244  ;;  %813 = vmatpush.msrb.mxu1 %v1243_v12  ;;  %1256 = vpow2.f32 %v767_v5 }
 0x14f   : > { %v1247_v15 = vpop.eup %1246  ;;  %1258 = vpow2.f32 %v699_v6  ;;  %851 = vmatpush.msrb.mxu3 %v1245_v2 }
 0x150   : > { %v1249_v53 = vpop.eup %1248  ;;  %814 = vmatpush.msrb.mxu1 %v1247_v15  ;;  %1260 = vpow2.f32 %v697_v0 }
 0x151   : > { %v1251_v20 = vpop.eup %1250  ;;  %852 = vmatpush.msrb.mxu3 %v1249_v53  ;;  %1262 = vpow2.f32 %v765_v13 }
 0x152   : > { %v1253_v48 = vpop.eup %1252  ;;  %815 = vmatpush.msrb.mxu1 %v1251_v20  ;;  %1264 = vpow2.f32 %v763_v16 }
 0x153   : > { %v1255_v22 = vpop.eup %1254  ;;  %853 = vmatpush.msrb.mxu3 %v1253_v48  ;;  %1266 = vpow2.f32 %v761_v21 }
 0x154   : > { %v1257_v43 = vpop.eup %1256  ;;  %816 = vmatpush.msrb.mxu1 %v1255_v22 }
 0x155   : > { %v1259_v14 = vpop.eup %1258  ;;  %854 = vmatpush.msrb.mxu3 %v1784_v56 }
 0x156   : > { %817 = vmatpush.msrb.mxu1 %v1259_v14  ;;  %v1261_v23 = vpop.eup %1260 }
 0x157   : > { %855 = vmatpush.msrb.mxu3 %v1257_v43  ;;  %v1263_v27 = vpop.eup %1262 }
 0x158   : > { %818 = vmatpush.msrb.mxu1 %v1261_v23  ;;  %v1265_v31 = vpop.eup %1264 }
 0x159   : > { %856 = vmatpush.msrb.mxu3 %v1263_v27  ;;  %819 = vmatmul.f32.vlgmr.msrb.gmra.mxu1 %v797_v45  ;;  %v1267_v36 = vpop.eup %1266 }
 0x15b   : > { %857 = vmatpush.msrb.mxu3 %v1265_v31 }
 0x15d   : > { %858 = vmatpush.msrb.mxu3 %v1267_v36 }
 0x15e   : > { %859 = vmatmul.f32.vlgmr.msrb.gmra.mxu3 %v799_v35 }
 0x1c2   : > { %v840_v56 = vpop.f32.mrf.mxu2 }
 0x1d6   : > { %v820_v40 = vpop.f32.mrf.mxu1 }
 0x1d7   : > { %v841_v41 = vadd.f32 %v840_v56, %v820_v40 }
 0x1e1   : > { %v860_v42 = vpop.f32.mrf.mxu3 }
 0x1e2   : > { %v861_v38 = vadd.f32 %v860_v42, %v841_v41 }
 0x1e4   : > { %v863_v32 = vadd.f32 %v861_v38, %v793_v37 }
 0x1e6   : > { %864 = vst [vmem:[#allocation2] sm:$0x3] %v863_v32 }
 0x1ed   : > { %v869_v44 = vld [vmem:[#allocation2 + $0x1] sm:$0x1]  ;;  %v868_v51 = vld [vmem:[#allocation2] sm:$0x1] }
 0x1ee   : > { %v870_v33 = vadd.f32 1e-08, %v869_v44 }
 0x1f0   : > { %1268 = vrcp.f32 %v870_v33  ;;  %v882_v34 = vand.u32 2147483648, %v870_v33  ;;  %v880_v49 = vand.u32 2147483647, %v870_v33  ;;  %vm876_vm2 = vweird.f32 %v870_v33 }
 0x1f2   : > { %v883_v30 = vor.u32 1.1754944e-38, %v882_v34  ;;  %vm881_vm4 = vcmp.eq.f32.partialorder %v880_v49, 8.507059e+37 }
 0x1f6   : > { %v1269_v46 = vpop.eup %1268 }
 0x1f7   : > { %v872_v47 = vmul.f32 %v1269_v46, %v870_v33  ;;  %vm877_vm1 = vweird.f32 %v1269_v46 }
 0x1f8   : > { %vm878_vm3 = vmor %vm876_vm2, %vm877_vm1 }
 0x1f9   : > { %v873_v28 = vsub.f32 1.0, %v872_v47 }
 0x1fb   : > { %v874_v29 = vmul.f32 %v1269_v46, %v873_v28 }
 0x1fd   : > { %v875_v50 = vadd.f32 %v1269_v46, %v874_v29 }
 0x1ff   : > { %v879_v24 = vsel %vm878_vm3, %v1269_v46, %v875_v50 }
 0x200   : > { %v884_v52 = vsel %vm881_vm4, %v883_v30, %v879_v24 }
 0x201   : > { %v885_v54 = vmul.f32 %v884_v52, %v868_v51 }
 0x203   : > { %886 = vst [vmem:[%s207_s4] sm:$0x1] %v885_v54 }
 0x204   : > { %1297 = shalt.err (!%p1294_p5)
}
 0x205   : > { %1116 = dma.vmem_to_hbm [thread:$0]  (%p1411_p4), %s899_s5, 16, %s901_s6, %s888_s7  }
 0x206 PF: > { %p1122_p6 = scmp.ge.s32.totalorder %s1348_s17, 2  ;;  %s912_s21 = sand.u32 1, %s1328_s12  }
 0x207   : > { %s913_s23 = scalar_lea.sflag [#allocation4], %s912_s21 }
 0x208   : > { %p1119_p7 = pnand %p1122_p6, %p1418_p8 }
 0x20a   : > { %p1120_p9 = pneg %p1119_p7 }
 0x20c   : > { %1323 = dma.done.wait (%p1120_p9), %s913_s23, 16  }
 0x20d   : > { %1325 = vsyncadd (%p1120_p9), %s913_s23, 4294967280  ;;  %s16_s17 = sadd.s32 1, %s1348_s17   ;;  %s1846_s12 = smov %s1332_s13 }
 0x20e   : > { %p13_p10 = scmp.ge.s32.totalorder %s16_s17, 4   ;;  %s1847_s13 = smov %s1336_s14 }
 0x20f   : > { %s1848_s14 = smov %s1424_s25  ;;  %s1849_s15 = smov %s1344_s16 }
 0x210   : > { %s1850_s16 = smov %s1852_s20  ;;  %15 = sbr.rel (!%p13_p10) target bundleno = 4 (0x4), region = 81 }
 0x215   :  { %918 = vsyncpa [#allocation4], 1 }
 0x216   :  { %920 = vsyncpa [#allocation4 + $0x1], 1 }

</bundles_post_ra>
